<compile_context>
chip_gen: v7x
topology: tpu7x:2x2x1
jax: 0.10.0
libtpu: 0.0.40
codegen_flags: <defaults>
</compile_context>

<pallas_src>
import jax
import jax.numpy as jnp
from jax.experimental import pallas as pl
from jax.experimental.pallas import tpu as pltpu


# ----------------------------------------------------------------------------
# Kernel
# ----------------------------------------------------------------------------
def _co_conv_kernel(m_ref, inv_ref, x_ref, o_ref):
    # One MXU matmul per (row-tile, feature-tile): bf16 inputs, f32 accumulate.
    acc = jnp.dot(m_ref[...], x_ref[...], preferred_element_type=jnp.float32)
    # Mean normalization: exact f32 1/in_degree, broadcast over the feature
    # tile.  Runs on the VPU while the MXU / DMA are the bottleneck.
    o_ref[...] = (acc * inv_ref[...]).astype(o_ref.dtype)


# ----------------------------------------------------------------------------
# Helpers
# ----------------------------------------------------------------------------
def _round_up(x, m):
    return (x + m - 1) // m * m


def _vmem_budget_bytes():
    """Generation-aware VMEM budget (~75% of physical): 96 MiB on v5e/v6e,
    48 MiB on v7x.  Falls back to a conservative 48 MiB if the query fails."""
    cap = 64 << 20
    try:
        info = pltpu.get_tpu_info()
        cap = int(getattr(info, "vmem_capacity_bytes", cap))
    except Exception:
        pass
    return int(cap * 3 // 4)


def _choose_tiles(up, dp, in_isz, out_isz, budget):
    """Pick the largest (tm, td) row/feature tiles that fit the VMEM budget.

    Larger tm minimizes re-reads of the feature matrix (streamed once per row
    tile); larger td minimizes grid steps.  Small problems collapse to
    tm=up, td=dp => grid=(1, 1)."""
    def need(tm, td):
        return (2 * tm * up * in_isz      # adjacency row block (double-buffered)
                + 2 * up * td * in_isz    # feature tile (double-buffered)
                + 2 * tm * td * out_isz   # output tile (double-buffered)
                + 2 * tm * 4              # inv-degree tile
                + (2 << 20))              # headroom for Mosaic internals

    tm_cands = [t for t in range(up, 0, -128) if up % t == 0]
    td_cands = [t for t in range(dp, 0, -128) if dp % t == 0]
    for tm in tm_cands:
        for td in td_cands:
            n = need(tm, td)
            if n <= budget:
                return tm, td, n
    # TODO(synk): graphs this large need the K-tiled / block-sparse path.
    tm, td = tm_cands[-1], td_cands[-1]
    return tm, td, need(tm, td)


# ----------------------------------------------------------------------------
# One-time graph preprocessing (hoisted out of the per-call path).
# ----------------------------------------------------------------------------
def prepare_graph(adj01, *, node_align=128):
    """adj01[dst, src] = 1.0 iff there is a 'friend' edge src -> dst.

    Returns (padded 0/1 bf16 adjacency [up, up], f32 1/in_degree [up, 1], U).
    Padded rows are isolated nodes (aggregate to exactly 0 and are sliced away);
    padded columns multiply zero-padded embedding rows, so results are exact.
    0/1 entries are exactly representable in bf16.
    """
    # Note: on v6e/v7x (2x256x256 MXUs), aligning to 256 keeps systolic passes
    # full; 128 is correct everywhere and optimal on v5e.
    U = adj01.shape[0]
    assert adj01.shape == (U, U)
    up = _round_up(U, node_align)

    deg = jnp.sum(adj01.astype(jnp.float32), axis=1)
    inv_deg = jnp.where(deg > 0.0, 1.0 / jnp.maximum(deg, 1.0), 0.0)

    adj_p = jnp.zeros((up, up), jnp.bfloat16).at[:U, :U].set(adj01.astype(jnp.bfloat16))
    inv_p = jnp.zeros((up, 1), jnp.float32).at[:U, 0].set(inv_deg.astype(jnp.float32))
    return adj_p, inv_p, U


# ----------------------------------------------------------------------------
# Forward pass
# ----------------------------------------------------------------------------
def co_conv(adj_p, inv_p, author_emb, *, out_dtype=jnp.float32):
    """Pallas CoConv forward.

    adj_p:      padded 0/1 bf16 in-adjacency [up, up]   (from prepare_graph)
    inv_p:      padded f32 1/in_degree        [up, 1]   (from prepare_graph)
    author_emb: author embeddings             [U, D]
    Returns out_dtype [U, D] with out[a] = mean of in-neighbor embeddings.
    Use out_dtype=jnp.bfloat16 to cut output HBM writeback when downstream
    tolerates it.
    """
    up = adj_p.shape[0]
    U, D = author_emb.shape
    assert adj_p.shape == (up, up) and inv_p.shape == (up, 1) and U <= up

    dp = _round_up(D, 128)
    x = jnp.zeros((up, dp), jnp.bfloat16).at[:U, :D].set(author_emb.astype(jnp.bfloat16))

    in_isz = 2
    out_isz = jnp.dtype(out_dtype).itemsize
    budget = _vmem_budget_bytes()
    tm, td, need = _choose_tiles(up, dp, in_isz, out_isz, budget)
    vmem_limit = int(min(budget, max(need + (4 << 20), 32 << 20)))

    # Grid: (row tiles, feature tiles); feature axis innermost so the adjacency
    # row block keeps the same block index across consecutive steps (no re-DMA).
    grid = (up // tm, dp // td)

    out = pl.pallas_call(
        _co_conv_kernel,
        out_shape=jax.ShapeDtypeStruct((up, dp), out_dtype),
        grid=grid,
        in_specs=[
            # Adjacency row block: streamed over the M axis, constant over D.
            pl.BlockSpec((tm, up), lambda i, j: (i, 0)),
            # Per-row 1/in_degree.
            pl.BlockSpec((tm, 1), lambda i, j: (i, 0)),
            # Feature tile: pipelined along the embedding dimension.
            pl.BlockSpec((up, td), lambda i, j: (0, j)),
        ],
        out_specs=pl.BlockSpec((tm, td), lambda i, j: (i, j)),
        compiler_params=pltpu.CompilerParams(
            # Both axes are independent (no reduction axis): shardable across
            # the 2 TensorCores on v7x, with row tiles preferred.
            dimension_semantics=("parallel", "parallel"),
            vmem_limit_bytes=vmem_limit,
        ),
    )(adj_p, inv_p, x)
    return out[:U, :D]


# ----------------------------------------------------------------------------
# Reference + demo
# ----------------------------------------------------------------------------
def _reference(adj01, author_emb):
    deg = jnp.maximum(adj01.sum(axis=1, keepdims=True), 1.0)
    return (adj01 / deg) @ author_emb


if __name__ == "__main__":
    key = jax.random.PRNGKey(0)
    k_adj, k_emb = jax.random.split(key)

    # Small shapes; exercise the padding path (20 -> 128 nodes) and a D that is
    # a non-power-of-two multiple of 128 (640) -> collapses to a single grid step.
    num_authors, emb_dim = 20, 640

    # Deterministic synthetic directed 'friend' graph: adj01[dst, src] = 1
    # means src -> dst (an in-edge of dst). No self-loops.
    adj01 = (jax.random.uniform(k_adj, (num_authors, num_authors)) < 0.4).astype(jnp.float32)
    adj01 = adj01 * (1.0 - jnp.eye(num_authors, dtype=jnp.float32))

    author_emb = jax.random.normal(k_emb, (num_authors, emb_dim), dtype=jnp.float32)

    # One-time graph prep (static graph), then the kernel forward.
    adj_p, inv_p, U = prepare_graph(adj01)
    out = co_conv(adj_p, inv_p, author_emb)
    out = jax.block_until_ready(out)

    ref = _reference(adj01, author_emb)
    assert out.shape == ref.shape
    max_err = float(jnp.max(jnp.abs(out - ref)))
    # Only error source left is bf16 quantization of the embeddings
    # (adjacency is exact 0/1 bf16; 1/deg is exact f32; f32 accumulation).
    assert jnp.allclose(out, ref, atol=2e-2, rtol=2e-2), max_err

    print("KERNEL_OK")
</pallas_src>

<mosaic_0001>
module attributes {stable_mosaic.version = 11 : i64} {
  func.func @_co_conv_kernel(%arg0: i32, %arg1: i32, %arg2: memref<128x128xbf16, #tpu.memory_space<vmem>>, %arg3: memref<128x1xf32, #tpu.memory_space<vmem>>, %arg4: memref<128x640xbf16, #tpu.memory_space<vmem>>, %arg5: memref<128x640xf32, #tpu.memory_space<vmem>>) attributes {dimension_semantics = [#tpu.dimension_semantics<parallel>, #tpu.dimension_semantics<parallel>], iteration_bounds = array<i64: 1, 1>, scalar_prefetch = 0 : i64, scratch_operands = 0 : i64, tpu.core_type = #tpu.core_type<tc>, window_params = [{transform_indices = @transform_0, window_bounds = array<i64: 128, 128>}, {transform_indices = @transform_1, window_bounds = array<i64: 128, 1>}, {transform_indices = @transform_2, window_bounds = array<i64: 128, 640>}, {transform_indices = @transform_3, window_bounds = array<i64: 128, 640>}]} {
    %c0 = arith.constant 0 : index
    %c0_0 = arith.constant 0 : index
    %0 = vector.load %arg2[%c0, %c0_0] : memref<128x128xbf16, #tpu.memory_space<vmem>>, vector<128x128xbf16>
    %c0_1 = arith.constant 0 : index
    %c0_2 = arith.constant 0 : index
    %1 = vector.load %arg4[%c0_1, %c0_2] : memref<128x640xbf16, #tpu.memory_space<vmem>>, vector<128x640xbf16>
    %cst = arith.constant dense<0.000000e+00> : vector<128x640xf32>
    %2 = tpu.matmul %0, %1, %cst {dimension_numbers = #tpu.dot_dimension_numbers<[1], [0], [0], [1], [0, 0, 1, 1], [], []>} : vector<128x128xbf16>, vector<128x640xbf16>, vector<128x640xf32> -> vector<128x640xf32>
    %c0_3 = arith.constant 0 : index
    %c0_4 = arith.constant 0 : index
    %3 = vector.load %arg3[%c0_3, %c0_4] : memref<128x1xf32, #tpu.memory_space<vmem>>, vector<128x1xf32>
    %4 = vector.broadcast %3 : vector<128x1xf32> to vector<128x640xf32>
    %5 = arith.mulf %2, %4 : vector<128x640xf32>
    %c0_5 = arith.constant 0 : index
    %c0_6 = arith.constant 0 : index
    %6 = vector.load %arg5[%c0_5, %c0_6] : memref<128x640xf32, #tpu.memory_space<vmem>>, vector<128x640xf32>
    tpu.vector_store %arg5[%c0_5, %c0_6], %5 {strides = array<i32>} : memref<128x640xf32, #tpu.memory_space<vmem>>, vector<128x640xf32>,
    return
  }
  func.func @transform_0(%arg0: i32, %arg1: i32) -> (i32, i32) {
    %c0_i32 = arith.constant 0 : i32
    %c0_i32_0 = arith.constant 0 : i32
    return %arg0, %c0_i32 : i32, i32
  }
  func.func @transform_1(%arg0: i32, %arg1: i32) -> (i32, i32) {
    %c0_i32 = arith.constant 0 : i32
    %c0_i32_0 = arith.constant 0 : i32
    return %arg0, %c0_i32 : i32, i32
  }
  func.func @transform_2(%arg0: i32, %arg1: i32) -> (i32, i32) {
    %c0_i32 = arith.constant 0 : i32
    %c0_i32_0 = arith.constant 0 : i32
    return %c0_i32, %arg1 : i32, i32
  }
  func.func @transform_3(%arg0: i32, %arg1: i32) -> (i32, i32) {
    %c0_i32 = arith.constant 0 : i32
    return %arg0, %arg1 : i32, i32
  }
}

</mosaic_0001>

<bundles_post_ra>
// kernel: tpu_custom_call.1
= control target key start
LH: loop header
LB: loop body
LE: loop exit
PB: predicated region body
PF: predicated region fallthrough
CT: control target
= control target key end

     0   :  { %8 = vsyncpa [#allocation3], 0  ;;  %s1440_s0 = inlined_call_operand.vmem [shape: bf16[128,128], index: 0, kind: input, shape index: {}]   ;;  %s1441_s1 = inlined_call_operand.vmem [shape: f32[128,1], index: 1, kind: input, shape index: {}]   ;;  %s1442_s2 = inlined_call_operand.hbm [shape: bf16[128,640], index: 2, kind: input, shape index: {}]   ;;  %s1443_s3 = inlined_call_operand.hbm [shape: f32[128,640], index: 3, kind: output, shape index: {}]  }
   0x1   :  { %9 = vsyncpa [#allocation4], 0  ;;  %s1179_s12 = smov [#allocation2]   ;;  %s1131_s16 = scalar_lea.hbm %s1442_s2, 5120 }
   0x2   :  { %s19_s13 = sshll.u32 %s1179_s12, 4  ;;  %p1132_p0 = scmp.ne.s32.totalorder %s1442_s2, %s1131_s16  ;;  %s20_s13 = int_to_ptr.vmem [resolvable:$true] %s19_s13 }
   0x3   :  { %p1135_p1 = scmp.lt.u32.totalorder %s1131_s16, %s1442_s2 }
   0x5   :  { %p1137_p2 = pnand %p1135_p1, %p1132_p0 }
   0x7   :  { %1140 = shalt.err (!%p1137_p2)
}
   0x8   :  { %s1141_s21 = scalar_lea.vmem %s20_s13, 5120  ;;  %p1146_p4 = scmp.lt.s32.totalorder %s20_s13, %s20_s13 }
   0x9   :  { %p1142_p3 = scmp.ne.s32.totalorder %s20_s13, %s1141_s21  ;;  %p1147_p5 = scmp.lt.s32.totalorder %s1141_s21, %s1141_s21 }
   0xb   :  { %p1148_p6 = por %p1147_p5, %p1146_p4 }
   0xd   :  { %p1149_p7 = pnand %p1148_p6, %p1142_p3 }
   0xf   :  { %1152 = shalt.err (!%p1149_p7)
}
  0x10   :  { %s1180_s22 = smov 320   ;;  %s1181_s23 = smov 20  }
  0x11   :  { %25 = dma.hbm_to_vmem [thread:$0]  %s1442_s2, 5120, %s20_s13, [#allocation3], %s1180_s22, %s1180_s22, %s1181_s23  }
  0x12   :  { %1175 = dma.done.wait [#allocation3], 5120  }
  0x13   :  { %1176 = vsyncadd [#allocation3], 4294962176  ;;  %v1182_v0 = vmov 0   ;;  %v1067_v1 = vld [vmem:[#allocation2 + $0x4] ss:$20 sps:$4 sm:$0xff]   ;;  %v675_v38 = vld [vmem:[%s1441_s1 + $0x10] sm:$0xff] }
  0x14   :  { %382 = vmatprep.mubr.bf16.mxu0 %v1182_v0  ;;  %495 = vmatprep.mubr.bf16.mxu1 %v1182_v0  ;;  %v1069_v2 = vld [vmem:[#allocation2 + $0xc] ss:$20 sps:$4 sm:$0xff]   ;;  %v1072_v4 = vld [vmem:[#allocation2 + $0x8] ss:$20 sps:$4 sm:$0xff]   ;;  %v1078_v8 = vld [vmem:[#allocation2 + $0x30] ss:$20 sps:$4 sm:$0xff]  }
  0x15   :  { %1065 = vset.pattern.permute.xlu0 %v1182_v0  ;;  %1066 = vset.pattern.permute.xlu1 %v1182_v0  ;;  %v1071_v3 = vld [vmem:[#allocation2] ss:$20 sps:$4 sm:$0xff]   ;;  %v1077_v7 = vld [vmem:[#allocation2 + $0x28] ss:$20 sps:$4 sm:$0xff]   ;;  %v1083_v11 = vld [vmem:[#allocation2 + $0x50] ss:$20 sps:$4 sm:$0xff]  }
  0x16   :  { %350 = vmatprep.subr.bf16.mxu0 %v1067_v1  ;;  %463 = vmatprep.subr.bf16.mxu1 %v1069_v2  ;;  %v1073_v5 = vld [vmem:[#allocation2 + $0x2c] ss:$20 sps:$4 sm:$0xff]   ;;  %v1075_v6 = vld [vmem:[#allocation2 + $0x34] ss:$20 sps:$4 sm:$0xff]   ;;  %v1081_v10 = vld [vmem:[#allocation2 + $0x5c] ss:$20 sps:$4 sm:$0xff]  }
  0x17   :  { %351 = vmatpush1.bf16.msra.mxu0 %v1071_v3  ;;  %464 = vmatpush1.bf16.msra.mxu1 %v1072_v4  ;;  %v1079_v9 = vld [vmem:[#allocation2 + $0x54] ss:$20 sps:$4 sm:$0xff]   ;;  %v1084_v12 = vld [vmem:[#allocation2 + $0x58] ss:$20 sps:$4 sm:$0xff]   ;;  %v1085_v13 = vld [vmem:[#allocation2 + $0x7c] ss:$20 sps:$4 sm:$0xff]  }
  0x18   :  { %352 = vmatprep.subr.bf16.mxu0 %v1073_v5  ;;  %465 = vmatprep.subr.bf16.mxu1 %v1075_v6  ;;  %v1087_v14 = vld [vmem:[#allocation2 + $0x84] ss:$20 sps:$4 sm:$0xff]   ;;  %v1090_v16 = vld [vmem:[#allocation2 + $0x80] ss:$20 sps:$4 sm:$0xff]   ;;  %v1096_v20 = vld [vmem:[#allocation2 + $0xa8] ss:$20 sps:$4 sm:$0xff]  }
  0x19   :  { %v1089_v15 = vld [vmem:[#allocation2 + $0x78] ss:$20 sps:$4 sm:$0xff]   ;;  %v1095_v19 = vld [vmem:[#allocation2 + $0xa0] ss:$20 sps:$4 sm:$0xff]   ;;  %v1101_v23 = vld [vmem:[#allocation2 + $0xc8] ss:$20 sps:$4 sm:$0xff]   ;;  %701 = vperm.xlu1 %1066, %v675_v38  }
  0x1a   :  { %v1091_v17 = vld [vmem:[#allocation2 + $0xa4] ss:$20 sps:$4 sm:$0xff]   ;;  %v1093_v18 = vld [vmem:[#allocation2 + $0xac] ss:$20 sps:$4 sm:$0xff]   ;;  %v1099_v22 = vld [vmem:[#allocation2 + $0xd4] ss:$20 sps:$4 sm:$0xff]  }
  0x1b   :  { %353 = vmatpush1.bf16.msra.mxu0 %v1077_v7  ;;  %466 = vmatpush1.bf16.msra.mxu1 %v1078_v8  ;;  %v1097_v21 = vld [vmem:[#allocation2 + $0xcc] ss:$20 sps:$4 sm:$0xff]   ;;  %v1102_v24 = vld [vmem:[#allocation2 + $0xd0] ss:$20 sps:$4 sm:$0xff]   ;;  %v1103_v25 = vld [vmem:[#allocation2 + $0xf4] ss:$20 sps:$4 sm:$0xff]  }
  0x1c   :  { %354 = vmatprep.subr.bf16.mxu0 %v1079_v9  ;;  %467 = vmatprep.subr.bf16.mxu1 %v1081_v10  ;;  %v1105_v26 = vld [vmem:[#allocation2 + $0xfc] ss:$20 sps:$4 sm:$0xff]   ;;  %v1108_v28 = vld [vmem:[#allocation2 + $0xf8] ss:$20 sps:$4 sm:$0xff]   ;;  %v1114_v32 = vld [vmem:[#allocation2 + $0x120] ss:$20 sps:$4 sm:$0xff]  }
  0x1d   :  { %v1107_v27 = vld [vmem:[#allocation2 + $0xf0] ss:$20 sps:$4 sm:$0xff]   ;;  %v1113_v31 = vld [vmem:[#allocation2 + $0x118] ss:$20 sps:$4 sm:$0xff]   ;;  %v1120_v36 = vld [vmem:[#allocation2 + $0x60] ss:$20 sps:$4 sm:$0xff]  }
  0x1e   :  { %v1109_v29 = vld [vmem:[#allocation2 + $0x11c] ss:$20 sps:$4 sm:$0xff]   ;;  %v1111_v30 = vld [vmem:[#allocation2 + $0x124] ss:$20 sps:$4 sm:$0xff]   ;;  %v1240_v39 = vld [vmem:[%s1440_s0 + $0x8] sm:$0xff]  }
  0x1f   :  { %355 = vmatpush1.bf16.msra.mxu0 %v1083_v11  ;;  %468 = vmatpush1.bf16.msra.mxu1 %v1084_v12  ;;  %v1116_v33 = vld [vmem:[#allocation2 + $0x10] ss:$20 sps:$4 sm:$0xff]   ;;  %v1118_v35 = vld [vmem:[#allocation2 + $0x38] ss:$20 sps:$4 sm:$0xff]   ;;  %v1122_v40 = vld [vmem:[#allocation2 + $0x88] ss:$20 sps:$4 sm:$0xff]  }
  0x20   :  { %356 = vmatprep.subr.bf16.mxu0 %v1085_v13  ;;  %469 = vmatprep.subr.bf16.mxu1 %v1087_v14  ;;  %v1225_v34 = vld [vmem:[%s1440_s0] sm:$0xff]   ;;  %v674_v41 = vld [vmem:[%s1441_s1 + $0x8] sm:$0xff]  ;;  %v676_v42 = vld [vmem:[%s1441_s1 + $0x18] sm:$0xff] }
  0x21   :  { %v673_v37 = vld [vmem:[%s1441_s1] sm:$0xff]  ;;  %v1255_v44 = vld [vmem:[%s1440_s0 + $0x10] sm:$0xff]   ;;  %706 = vperm.xlu1 %1066, %v676_v42   ;;  %v1126_v45 = vld [vmem:[#allocation2 + $0xd8] ss:$20 sps:$4 sm:$0xff]  }
  0x22   :  { %691 = vperm.xlu0 %1065, %v673_v37   ;;  %v1124_v43 = vld [vmem:[#allocation2 + $0xb0] ss:$20 sps:$4 sm:$0xff]   ;;  %v678_v47 = vld [vmem:[%s1441_s1 + $0x28] sm:$0xff]  ;;  %v1128_v48 = vld [vmem:[#allocation2 + $0x100] ss:$20 sps:$4 sm:$0xff]  }
  0x23   :  { %357 = vmatpush1.bf16.msra.mxu0 %v1089_v15  ;;  %470 = vmatpush1.bf16.msra.mxu1 %v1090_v16  ;;  %v677_v46 = vld [vmem:[%s1441_s1 + $0x20] sm:$0xff]  ;;  %v1121_v49 = vld [vmem:[%s1440_s0 + $0x18] sm:$0xff]   ;;  %v679_v51 = vld [vmem:[%s1441_s1 + $0x30] sm:$0xff] }
  0x24   :  { %358 = vmatprep.subr.bf16.mxu0 %v1091_v17  ;;  %471 = vmatprep.subr.bf16.mxu1 %v1093_v18  ;;  %v1130_v50 = vld [vmem:[#allocation2 + $0x128] ss:$20 sps:$4 sm:$0xff]   ;;  %v1123_v53 = vld [vmem:[%s1440_s0 + $0x20] sm:$0xff]   ;;  %v683_v57 = vld [vmem:[%s1441_s1 + $0x50] sm:$0xff] }
  0x25   :  { %716 = vperm.xlu1 %1066, %v678_v47   ;;  %v680_v52 = vld [vmem:[%s1441_s1 + $0x38] sm:$0xff]  ;;  %v681_v54 = vld [vmem:[%s1441_s1 + $0x40] sm:$0xff]  ;;  %v682_v55 = vld [vmem:[%s1441_s1 + $0x48] sm:$0xff] }
  0x26   :  { %696 = vperm.xlu0 %1065, %v674_v41   ;;  %v684_v56 = vld [vmem:[%s1441_s1 + $0x58] sm:$0xff]  ;;  %v1125_v58 = vld [vmem:[%s1440_s0 + $0x28] sm:$0xff]   ;;  %v685_v60 = vld [vmem:[%s1441_s1 + $0x60] sm:$0xff] }
  0x27   :  { %359 = vmatpush1.bf16.msra.mxu0 %v1095_v19  ;;  %472 = vmatpush1.bf16.msra.mxu1 %v1096_v20  ;;  %v686_v59 = vld [vmem:[%s1441_s1 + $0x68] sm:$0xff]  ;;  %v688_v61 = vld [vmem:[%s1441_s1 + $0x78] sm:$0xff]  ;;  %v687_v62 = vld [vmem:[%s1441_s1 + $0x70] sm:$0xff] }
  0x28   :  { %360 = vmatprep.subr.bf16.mxu0 %v1097_v21  ;;  %473 = vmatprep.subr.bf16.mxu1 %v1099_v22  ;;  %v1127_v63 = vld [vmem:[%s1440_s0 + $0x30] sm:$0xff]   ;;  %v1129_v1 = vld [vmem:[%s1440_s0 + $0x38] sm:$0xff]   ;;  %s1183_s0 = smov [#allocation5]  }
  0x29   :  { %726 = vperm.xlu1 %1066, %v680_v52   ;;  %s934_s1 = sshll.u32 %s1183_s0, 4  ;;  %s935_s1 = int_to_ptr.vmem [resolvable:$true] %s934_s1 }
  0x2a   :  { %711 = vperm.xlu0 %1065, %v677_v46   ;;  %s1153_s18 = scalar_lea.vmem %s935_s1, 10240  ;;  %p1158_p9 = scmp.lt.s32.totalorder %s935_s1, %s935_s1 }
  0x2b   :  { %361 = vmatpush1.bf16.msra.mxu0 %v1101_v23  ;;  %474 = vmatpush1.bf16.msra.mxu1 %v1102_v24  ;;  %p1154_p8 = scmp.ne.s32.totalorder %s935_s1, %s1153_s18  ;;  %p1159_p10 = scmp.lt.s32.totalorder %s1153_s18, %s1153_s18 }
  0x2c   :  { %362 = vmatprep.subr.bf16.mxu0 %v1103_v25  ;;  %475 = vmatprep.subr.bf16.mxu1 %v1105_v26 }
  0x2d   :  { %736 = vperm.xlu1 %1066, %v682_v55   ;;  %p1160_p11 = por %p1159_p10, %p1158_p9 }
  0x2e   :  { %721 = vperm.xlu0 %1065, %v679_v51  }
  0x2f   :  { %363 = vmatpush1.bf16.msra.mxu0 %v1107_v27  ;;  %476 = vmatpush1.bf16.msra.mxu1 %v1108_v28  ;;  %p1161_p12 = pnand %p1160_p11, %p1154_p8 }
  0x30   :  { %364 = vmatprep.subr.bf16.mxu0 %v1109_v29  ;;  %477 = vmatprep.subr.bf16.mxu1 %v1111_v30 }
  0x31   :  { %746 = vperm.xlu1 %1066, %v684_v56  }
  0x32   :  { %731 = vperm.xlu0 %1065, %v681_v54  }
  0x33   :  { %365 = vmatpush1.bf16.msra.mxu0 %v1113_v31  ;;  %478 = vmatpush1.bf16.msra.mxu1 %v1114_v32 }
  0x34   :  { %1010 = vmatprep.subr.bf16.mxu0 %v1116_v33  ;;  %1042 = vmatprep.subr.bf16.mxu1 %v1116_v33 }
  0x35   :  { %756 = vperm.xlu1 %1066, %v686_v59  }
  0x36   :  { %383 = vmatmul.mubr.bf16.vlgmr.msra.gmra.mrb[0].mxu0 %v1225_v34  ;;  %496 = vmatmul.mubr.bf16.vlgmr.msra.gmra.mrb[0].mxu1 %v1225_v34 }
  0x37   :  { %1011 = vmatpush3.bf16.msra.mxu0 %v1116_v33  ;;  %1050 = vmatpush3.bf16.msra.mxu1 %v1116_v33 }
  0x38   :  { %392 = vmatprep.mubr.bf16.mxu0 %v1182_v0  ;;  %505 = vmatprep.mubr.bf16.mxu1 %v1182_v0 }
  0x39   :  { %1012 = vmatprep.subr.bf16.mxu0 %v1118_v35  ;;  %1043 = vmatprep.subr.bf16.mxu1 %v1118_v35 }
  0x3a   :  { %741 = vperm.xlu0 %1065, %v683_v57   ;;  %766 = vperm.xlu1 %1066, %v688_v61  }
  0x3b   :  { %1013 = vmatpush3.bf16.msra.mxu0 %v1118_v35  ;;  %1051 = vmatpush3.bf16.msra.mxu1 %v1118_v35 }
  0x3c   :  { %1014 = vmatprep.subr.bf16.mxu0 %v1120_v36  ;;  %1044 = vmatprep.subr.bf16.mxu1 %v1120_v36 }
  0x3e   :  { %393 = vmatmul.mubr.bf16.gmra.mrb[4].mxu0 %v1240_v39  ;;  %506 = vmatmul.mubr.bf16.gmra.mrb[4].mxu1 %v1240_v39 }
  0x3f   :  { %402 = vmatprep.mubr.bf16.mxu0 %v1182_v0  ;;  %515 = vmatprep.mubr.bf16.mxu1 %v1182_v0 }
  0x40   :  { %1015 = vmatpush3.bf16.msra.mxu0 %v1120_v36  ;;  %1052 = vmatpush3.bf16.msra.mxu1 %v1120_v36 }
  0x41   :  { %1016 = vmatprep.subr.bf16.mxu0 %v1122_v40  ;;  %1045 = vmatprep.subr.bf16.mxu1 %v1122_v40 }
  0x42   :  { %751 = vperm.xlu0 %1065, %v685_v60  }
  0x44   :  { %1017 = vmatpush3.bf16.msra.mxu0 %v1122_v40  ;;  %1053 = vmatpush3.bf16.msra.mxu1 %v1122_v40 }
  0x45   :  { %1018 = vmatprep.subr.bf16.mxu0 %v1124_v43  ;;  %1046 = vmatprep.subr.bf16.mxu1 %v1124_v43 }
  0x46   :  { %403 = vmatmul.mubr.bf16.gmra.mrb[8].mxu0 %v1255_v44  ;;  %516 = vmatmul.mubr.bf16.gmra.mrb[8].mxu1 %v1255_v44 }
  0x47   :  { %412 = vmatprep.mubr.bf16.mxu0 %v1182_v0  ;;  %525 = vmatprep.mubr.bf16.mxu1 %v1182_v0 }
  0x48   :  { %1019 = vmatpush3.bf16.msra.mxu0 %v1124_v43  ;;  %1054 = vmatpush3.bf16.msra.mxu1 %v1124_v43 }
  0x49   :  { %1020 = vmatprep.subr.bf16.mxu0 %v1126_v45  ;;  %1047 = vmatprep.subr.bf16.mxu1 %v1126_v45 }
  0x4a   :  { %761 = vperm.xlu0 %1065, %v687_v62  }
  0x4c   :  { %1021 = vmatpush3.bf16.msra.mxu0 %v1126_v45  ;;  %1055 = vmatpush3.bf16.msra.mxu1 %v1126_v45 }
  0x4d   :  { %1022 = vmatprep.subr.bf16.mxu0 %v1128_v48  ;;  %1048 = vmatprep.subr.bf16.mxu1 %v1128_v48 }
  0x4e   :  { %413 = vmatmul.mubr.bf16.gmra.mrb[12].mxu0 %v1121_v49  ;;  %526 = vmatmul.mubr.bf16.gmra.mrb[12].mxu1 %v1121_v49 }
  0x4f   :  { %422 = vmatprep.mubr.bf16.mxu0 %v1182_v0  ;;  %535 = vmatprep.mubr.bf16.mxu1 %v1182_v0 }
  0x50   :  { %1023 = vmatpush3.bf16.msra.mxu0 %v1128_v48  ;;  %1056 = vmatpush3.bf16.msra.mxu1 %v1128_v48 }
  0x51   :  { %1024 = vmatprep.subr.bf16.mxu0 %v1130_v50  ;;  %1049 = vmatprep.subr.bf16.mxu1 %v1130_v50 }
  0x54   :  { %1025 = vmatpush3.bf16.msra.mxu0 %v1130_v50  ;;  %1057 = vmatpush3.bf16.msra.mxu1 %v1130_v50 }
  0x56   :  { %423 = vmatmul.mubr.bf16.gmra.mrb[16].mxu0 %v1123_v53  ;;  %536 = vmatmul.mubr.bf16.gmra.mrb[16].mxu1 %v1123_v53 }
  0x57   :  { %432 = vmatprep.mubr.bf16.mxu0 %v1182_v0  ;;  %545 = vmatprep.mubr.bf16.mxu1 %v1182_v0 }
  0x5e   :  { %433 = vmatmul.mubr.bf16.gmra.mrb[20].mxu0 %v1125_v58  ;;  %546 = vmatmul.mubr.bf16.gmra.mrb[20].mxu1 %v1125_v58 }
  0x5f   :  { %442 = vmatprep.mubr.bf16.mxu0 %v1182_v0  ;;  %555 = vmatprep.mubr.bf16.mxu1 %v1182_v0 }
  0x66   :  { %443 = vmatmul.mubr.bf16.gmra.mrb[24].mxu0 %v1127_v63  ;;  %556 = vmatmul.mubr.bf16.gmra.mrb[24].mxu1 %v1127_v63 }
  0x67   :  { %452 = vmatprep.mubr.bf16.mxu0 %v1182_v0  ;;  %565 = vmatprep.mubr.bf16.mxu1 %v1182_v0 }
  0x6e   :  { %453 = vmatmul.mubr.bf16.gmra.mrb[28].mxu0 %v1129_v1  ;;  %566 = vmatmul.mubr.bf16.gmra.mrb[28].mxu1 %v1129_v1 }
  0x6f   :  { %1026 = vmatprep.mubr.bf16.mxu0 %v1225_v34  ;;  %1034 = vmatprep.mubr.bf16.mxu1 %v1123_v53 }
  0x76   :  { %1027 = vmatmul.mubr.bf16.vlgmr.msra.gmra.mrb[32].mxu0 %v1240_v39  ;;  %1035 = vmatmul.mubr.bf16.vlgmr.msra.gmra.mrb[32].mxu1 %v1125_v58 }
  0x77   :  { %1030 = vmatprep.mubr.bf16.mxu0 %v1255_v44  ;;  %1038 = vmatprep.mubr.bf16.mxu1 %v1127_v63 }
  0x7e   :  { %1031 = vmatmul.mubr.bf16.gmra.mrb[36].mxu0 %v1121_v49  ;;  %1039 = vmatmul.mubr.bf16.gmra.mrb[36].mxu1 %v1129_v1 }
  0x98   :  { %v1327_v3 = vpop.permute.xlu1 %701 }
  0xa0   :  { %v1337_v20 = vpop.permute.xlu1 %706 }
  0xa1   :  { %v1323_v2 = vpop.permute.xlu0 %691 }
  0xa4   :  { %v1349_v38 = vpop.permute.xlu1 %716 }
  0xa5   :  { %v1325_v0 = vpop.permute.xlu0 %696 }
  0xa8   :  { %v1361_v56 = vpop.permute.xlu1 %726 }
  0xa9   :  { %v1347_v37 = vpop.permute.xlu0 %711 }
  0xad   :  { %v1359_v55 = vpop.permute.xlu0 %721 }
 0x109   :  { %v384_v4 = vpop.f32.mrb[0].mxu0  ;;  %v497_v5 = vpop.f32.mrb[0].mxu1 }
 0x10a   :  { %v769_v6 = vmul.f32 %v1323_v2, %v384_v4  ;;  %v771_v7 = vmul.f32 %v1323_v2, %v497_v5  ;;  %v386_v8 = vpop.f32.mrb[1].mxu0  ;;  %v499_v9 = vpop.f32.mrb[1].mxu1 }
 0x10b   :  { %v770_v10 = vmul.f32 %v1323_v2, %v386_v8  ;;  %v772_v11 = vmul.f32 %v1323_v2, %v499_v9  ;;  %v388_v12 = vpop.f32.mrb[2].mxu0  ;;  %v501_v13 = vpop.f32.mrb[2].mxu1 }
 0x10c   :  { %849 = vst [vmem:[#allocation5] sm:$0xff] %v769_v6  ;;  %851 = vst [vmem:[#allocation5 + $0x10] sm:$0xff] %v771_v7  ;;  %v774_v14 = vmul.f32 %v1325_v0, %v388_v12  ;;  %v776_v15 = vmul.f32 %v1325_v0, %v501_v13  ;;  %v390_v16 = vpop.f32.mrb[3].mxu0  ;;  %v503_v17 = vpop.f32.mrb[3].mxu1 }
 0x10d   :  { %850 = vst [vmem:[#allocation5 + $0x8] sm:$0xff] %v770_v10  ;;  %852 = vst [vmem:[#allocation5 + $0x18] sm:$0xff] %v772_v11  ;;  %v775_v18 = vmul.f32 %v1325_v0, %v390_v16  ;;  %v777_v19 = vmul.f32 %v1325_v0, %v503_v17  ;;  %v1371_v12 = vpop.permute.xlu0 %731  ;;  %v1373_v13 = vpop.permute.xlu1 %736 }
 0x10e   :  { %854 = vst [vmem:[#allocation5 + $0x28] sm:$0xff] %v774_v14  ;;  %856 = vst [vmem:[#allocation5 + $0x38] sm:$0xff] %v776_v15 }
 0x10f   :  { %855 = vst [vmem:[#allocation5 + $0x30] sm:$0xff] %v775_v18  ;;  %857 = vst [vmem:[#allocation5 + $0x40] sm:$0xff] %v777_v19 }
 0x111   :  { %v394_v21 = vpop.f32.mrb[4].mxu0  ;;  %v507_v22 = vpop.f32.mrb[4].mxu1 }
 0x112   :  { %v779_v23 = vmul.f32 %v1327_v3, %v394_v21  ;;  %v781_v24 = vmul.f32 %v1327_v3, %v507_v22  ;;  %v396_v25 = vpop.f32.mrb[5].mxu0  ;;  %v509_v26 = vpop.f32.mrb[5].mxu1 }
 0x113   :  { %v780_v27 = vmul.f32 %v1327_v3, %v396_v25  ;;  %v782_v28 = vmul.f32 %v1327_v3, %v509_v26  ;;  %v398_v29 = vpop.f32.mrb[6].mxu0  ;;  %v511_v30 = vpop.f32.mrb[6].mxu1 }
 0x114   :  { %859 = vst [vmem:[#allocation5 + $0x50] sm:$0xff] %v779_v23  ;;  %861 = vst [vmem:[#allocation5 + $0x60] sm:$0xff] %v781_v24  ;;  %v784_v31 = vmul.f32 %v1337_v20, %v398_v29  ;;  %v786_v32 = vmul.f32 %v1337_v20, %v511_v30  ;;  %v400_v33 = vpop.f32.mrb[7].mxu0  ;;  %v513_v34 = vpop.f32.mrb[7].mxu1 }
 0x115   :  { %860 = vst [vmem:[#allocation5 + $0x58] sm:$0xff] %v780_v27  ;;  %862 = vst [vmem:[#allocation5 + $0x68] sm:$0xff] %v782_v28  ;;  %v785_v35 = vmul.f32 %v1337_v20, %v400_v33  ;;  %v787_v36 = vmul.f32 %v1337_v20, %v513_v34 }
 0x116   :  { %864 = vst [vmem:[#allocation5 + $0x78] sm:$0xff] %v784_v31  ;;  %866 = vst [vmem:[#allocation5 + $0x88] sm:$0xff] %v786_v32  ;;  %v1383_v31 = vpop.permute.xlu0 %741  ;;  %v1385_v32 = vpop.permute.xlu1 %746 }
 0x117   :  { %865 = vst [vmem:[#allocation5 + $0x80] sm:$0xff] %v785_v35  ;;  %867 = vst [vmem:[#allocation5 + $0x90] sm:$0xff] %v787_v36 }
 0x119   :  { %v404_v39 = vpop.f32.mrb[8].mxu0  ;;  %v517_v40 = vpop.f32.mrb[8].mxu1 }
 0x11a   :  { %v789_v41 = vmul.f32 %v1347_v37, %v404_v39  ;;  %v791_v42 = vmul.f32 %v1347_v37, %v517_v40  ;;  %v406_v43 = vpop.f32.mrb[9].mxu0  ;;  %v519_v44 = vpop.f32.mrb[9].mxu1 }
 0x11b   :  { %v790_v45 = vmul.f32 %v1347_v37, %v406_v43  ;;  %v792_v46 = vmul.f32 %v1347_v37, %v519_v44  ;;  %v408_v47 = vpop.f32.mrb[10].mxu0  ;;  %v521_v48 = vpop.f32.mrb[10].mxu1 }
 0x11c   :  { %869 = vst [vmem:[#allocation5 + $0xa0] sm:$0xff] %v789_v41  ;;  %871 = vst [vmem:[#allocation5 + $0xb0] sm:$0xff] %v791_v42  ;;  %v794_v49 = vmul.f32 %v1349_v38, %v408_v47  ;;  %v796_v50 = vmul.f32 %v1349_v38, %v521_v48  ;;  %v410_v51 = vpop.f32.mrb[11].mxu0  ;;  %v523_v52 = vpop.f32.mrb[11].mxu1 }
 0x11d   :  { %870 = vst [vmem:[#allocation5 + $0xa8] sm:$0xff] %v790_v45  ;;  %872 = vst [vmem:[#allocation5 + $0xb8] sm:$0xff] %v792_v46  ;;  %v795_v53 = vmul.f32 %v1349_v38, %v410_v51  ;;  %v797_v54 = vmul.f32 %v1349_v38, %v523_v52  ;;  %v1395_v51 = vpop.permute.xlu1 %756  ;;  %v1397_v52 = vpop.permute.xlu0 %751 }
 0x11e   :  { %874 = vst [vmem:[#allocation5 + $0xc8] sm:$0xff] %v794_v49  ;;  %876 = vst [vmem:[#allocation5 + $0xd8] sm:$0xff] %v796_v50 }
 0x11f   :  { %875 = vst [vmem:[#allocation5 + $0xd0] sm:$0xff] %v795_v53  ;;  %877 = vst [vmem:[#allocation5 + $0xe0] sm:$0xff] %v797_v54 }
 0x121   :  { %v414_v57 = vpop.f32.mrb[12].mxu0  ;;  %v527_v58 = vpop.f32.mrb[12].mxu1 }
 0x122   :  { %v799_v59 = vmul.f32 %v1359_v55, %v414_v57  ;;  %v801_v60 = vmul.f32 %v1359_v55, %v527_v58  ;;  %v416_v61 = vpop.f32.mrb[13].mxu0  ;;  %v529_v62 = vpop.f32.mrb[13].mxu1 }
 0x123   :  { %v800_v63 = vmul.f32 %v1359_v55, %v416_v61  ;;  %v802_v1 = vmul.f32 %v1359_v55, %v529_v62  ;;  %v418_v4 = vpop.f32.mrb[14].mxu0  ;;  %v531_v5 = vpop.f32.mrb[14].mxu1 }
 0x124   :  { %879 = vst [vmem:[#allocation5 + $0xf0] sm:$0xff] %v799_v59  ;;  %881 = vst [vmem:[#allocation5 + $0x100] sm:$0xff] %v801_v60  ;;  %v804_v6 = vmul.f32 %v1361_v56, %v418_v4  ;;  %v806_v7 = vmul.f32 %v1361_v56, %v531_v5  ;;  %v420_v8 = vpop.f32.mrb[15].mxu0  ;;  %v533_v9 = vpop.f32.mrb[15].mxu1 }
 0x125   :  { %880 = vst [vmem:[#allocation5 + $0xf8] sm:$0xff] %v800_v63  ;;  %882 = vst [vmem:[#allocation5 + $0x108] sm:$0xff] %v802_v1  ;;  %v805_v10 = vmul.f32 %v1361_v56, %v420_v8  ;;  %v807_v11 = vmul.f32 %v1361_v56, %v533_v9 }
 0x126   :  { %884 = vst [vmem:[#allocation5 + $0x118] sm:$0xff] %v804_v6  ;;  %886 = vst [vmem:[#allocation5 + $0x128] sm:$0xff] %v806_v7 }
 0x127   :  { %885 = vst [vmem:[#allocation5 + $0x120] sm:$0xff] %v805_v10  ;;  %887 = vst [vmem:[#allocation5 + $0x130] sm:$0xff] %v807_v11  ;;  %v1407_v10 = vpop.permute.xlu1 %766  ;;  %v762_v11 = vpop.permute.xlu0 %761 }
 0x129   :  { %v424_v14 = vpop.f32.mrb[16].mxu0  ;;  %v537_v15 = vpop.f32.mrb[16].mxu1 }
 0x12a   :  { %v809_v16 = vmul.f32 %v1371_v12, %v424_v14  ;;  %v811_v17 = vmul.f32 %v1371_v12, %v537_v15  ;;  %v426_v18 = vpop.f32.mrb[17].mxu0  ;;  %v539_v19 = vpop.f32.mrb[17].mxu1 }
 0x12b   :  { %v810_v21 = vmul.f32 %v1371_v12, %v426_v18  ;;  %v812_v22 = vmul.f32 %v1371_v12, %v539_v19  ;;  %v428_v23 = vpop.f32.mrb[18].mxu0  ;;  %v541_v24 = vpop.f32.mrb[18].mxu1 }
 0x12c   :  { %889 = vst [vmem:[#allocation5 + $0x140] sm:$0xff] %v809_v16  ;;  %891 = vst [vmem:[#allocation5 + $0x150] sm:$0xff] %v811_v17  ;;  %v814_v25 = vmul.f32 %v1373_v13, %v428_v23  ;;  %v816_v26 = vmul.f32 %v1373_v13, %v541_v24  ;;  %v430_v27 = vpop.f32.mrb[19].mxu0  ;;  %v543_v28 = vpop.f32.mrb[19].mxu1 }
 0x12d   :  { %890 = vst [vmem:[#allocation5 + $0x148] sm:$0xff] %v810_v21  ;;  %892 = vst [vmem:[#allocation5 + $0x158] sm:$0xff] %v812_v22  ;;  %v815_v29 = vmul.f32 %v1373_v13, %v430_v27  ;;  %v817_v30 = vmul.f32 %v1373_v13, %v543_v28 }
 0x12e   :  { %894 = vst [vmem:[#allocation5 + $0x168] sm:$0xff] %v814_v25  ;;  %896 = vst [vmem:[#allocation5 + $0x178] sm:$0xff] %v816_v26 }
 0x12f   :  { %895 = vst [vmem:[#allocation5 + $0x170] sm:$0xff] %v815_v29  ;;  %897 = vst [vmem:[#allocation5 + $0x180] sm:$0xff] %v817_v30 }
 0x131   :  { %v434_v33 = vpop.f32.mrb[20].mxu0  ;;  %v547_v34 = vpop.f32.mrb[20].mxu1 }
 0x132   :  { %v819_v35 = vmul.f32 %v1383_v31, %v434_v33  ;;  %v821_v36 = vmul.f32 %v1383_v31, %v547_v34  ;;  %v436_v39 = vpop.f32.mrb[21].mxu0  ;;  %v549_v40 = vpop.f32.mrb[21].mxu1 }
 0x133   :  { %v820_v41 = vmul.f32 %v1383_v31, %v436_v39  ;;  %v822_v42 = vmul.f32 %v1383_v31, %v549_v40  ;;  %v438_v43 = vpop.f32.mrb[22].mxu0  ;;  %v551_v44 = vpop.f32.mrb[22].mxu1 }
 0x134   :  { %899 = vst [vmem:[#allocation5 + $0x190] sm:$0xff] %v819_v35  ;;  %901 = vst [vmem:[#allocation5 + $0x1a0] sm:$0xff] %v821_v36  ;;  %v824_v45 = vmul.f32 %v1385_v32, %v438_v43  ;;  %v826_v46 = vmul.f32 %v1385_v32, %v551_v44  ;;  %v440_v47 = vpop.f32.mrb[23].mxu0  ;;  %v553_v48 = vpop.f32.mrb[23].mxu1 }
 0x135   :  { %900 = vst [vmem:[#allocation5 + $0x198] sm:$0xff] %v820_v41  ;;  %902 = vst [vmem:[#allocation5 + $0x1a8] sm:$0xff] %v822_v42  ;;  %v825_v49 = vmul.f32 %v1385_v32, %v440_v47  ;;  %v827_v50 = vmul.f32 %v1385_v32, %v553_v48 }
 0x136   :  { %904 = vst [vmem:[#allocation5 + $0x1b8] sm:$0xff] %v824_v45  ;;  %906 = vst [vmem:[#allocation5 + $0x1c8] sm:$0xff] %v826_v46 }
 0x137   :  { %905 = vst [vmem:[#allocation5 + $0x1c0] sm:$0xff] %v825_v49  ;;  %907 = vst [vmem:[#allocation5 + $0x1d0] sm:$0xff] %v827_v50 }
 0x139   :  { %v444_v53 = vpop.f32.mrb[24].mxu0  ;;  %v557_v54 = vpop.f32.mrb[24].mxu1 }
 0x13a   :  { %v829_v57 = vmul.f32 %v1397_v52, %v444_v53  ;;  %v831_v58 = vmul.f32 %v1397_v52, %v557_v54  ;;  %v446_v59 = vpop.f32.mrb[25].mxu0  ;;  %v559_v60 = vpop.f32.mrb[25].mxu1 }
 0x13b   :  { %v830_v61 = vmul.f32 %v1397_v52, %v446_v59  ;;  %v832_v62 = vmul.f32 %v1397_v52, %v559_v60  ;;  %v448_v63 = vpop.f32.mrb[26].mxu0  ;;  %v561_v1 = vpop.f32.mrb[26].mxu1 }
 0x13c   :  { %909 = vst [vmem:[#allocation5 + $0x1e0] sm:$0xff] %v829_v57  ;;  %911 = vst [vmem:[#allocation5 + $0x1f0] sm:$0xff] %v831_v58  ;;  %v834_v4 = vmul.f32 %v1395_v51, %v448_v63  ;;  %v836_v5 = vmul.f32 %v1395_v51, %v561_v1  ;;  %v450_v6 = vpop.f32.mrb[27].mxu0  ;;  %v563_v7 = vpop.f32.mrb[27].mxu1 }
 0x13d   :  { %910 = vst [vmem:[#allocation5 + $0x1e8] sm:$0xff] %v830_v61  ;;  %912 = vst [vmem:[#allocation5 + $0x1f8] sm:$0xff] %v832_v62  ;;  %v835_v8 = vmul.f32 %v1395_v51, %v450_v6  ;;  %v837_v9 = vmul.f32 %v1395_v51, %v563_v7 }
 0x13e   :  { %914 = vst [vmem:[#allocation5 + $0x208] sm:$0xff] %v834_v4  ;;  %916 = vst [vmem:[#allocation5 + $0x218] sm:$0xff] %v836_v5 }
 0x13f   :  { %915 = vst [vmem:[#allocation5 + $0x210] sm:$0xff] %v835_v8  ;;  %917 = vst [vmem:[#allocation5 + $0x220] sm:$0xff] %v837_v9 }
 0x141   :  { %v454_v14 = vpop.f32.mrb[28].mxu0  ;;  %v567_v15 = vpop.f32.mrb[28].mxu1 }
 0x142   :  { %v839_v16 = vmul.f32 %v762_v11, %v454_v14  ;;  %v841_v17 = vmul.f32 %v762_v11, %v567_v15  ;;  %v456_v18 = vpop.f32.mrb[29].mxu0  ;;  %v569_v19 = vpop.f32.mrb[29].mxu1 }
 0x143   :  { %v840_v21 = vmul.f32 %v762_v11, %v456_v18  ;;  %v842_v22 = vmul.f32 %v762_v11, %v569_v19  ;;  %v458_v23 = vpop.f32.mrb[30].mxu0  ;;  %v571_v24 = vpop.f32.mrb[30].mxu1 }
 0x144   :  { %919 = vst [vmem:[#allocation5 + $0x230] sm:$0xff] %v839_v16  ;;  %921 = vst [vmem:[#allocation5 + $0x240] sm:$0xff] %v841_v17  ;;  %v844_v25 = vmul.f32 %v1407_v10, %v458_v23  ;;  %v846_v26 = vmul.f32 %v1407_v10, %v571_v24  ;;  %v460_v27 = vpop.f32.mrb[31].mxu0  ;;  %v573_v28 = vpop.f32.mrb[31].mxu1 }
 0x145   :  { %920 = vst [vmem:[#allocation5 + $0x238] sm:$0xff] %v840_v21  ;;  %922 = vst [vmem:[#allocation5 + $0x248] sm:$0xff] %v842_v22  ;;  %v845_v29 = vmul.f32 %v1407_v10, %v460_v27  ;;  %v847_v30 = vmul.f32 %v1407_v10, %v573_v28 }
 0x146   :  { %924 = vst [vmem:[#allocation5 + $0x258] sm:$0xff] %v844_v25  ;;  %926 = vst [vmem:[#allocation5 + $0x268] sm:$0xff] %v846_v26 }
 0x147   :  { %925 = vst [vmem:[#allocation5 + $0x260] sm:$0xff] %v845_v29  ;;  %927 = vst [vmem:[#allocation5 + $0x270] sm:$0xff] %v847_v30 }
 0x149   :  { %v1028_v33 = vpop.f32.mrb[32].mxu0  ;;  %v1036_v34 = vpop.f32.mrb[32].mxu1 }
 0x14a   :  { %v783_v35 = vmul.f32 %v1028_v33, %v1327_v3  ;;  %v823_v36 = vmul.f32 %v1036_v34, %v1383_v31  ;;  %v610_v39 = vpop.f32.mrb[33].mxu0  ;;  %v642_v40 = vpop.f32.mrb[33].mxu1 }
 0x14b   :  { %v773_v41 = vmul.f32 %v1323_v2, %v610_v39  ;;  %v813_v42 = vmul.f32 %v1371_v12, %v642_v40  ;;  %v1029_v43 = vpop.f32.mrb[34].mxu0  ;;  %v1037_v44 = vpop.f32.mrb[34].mxu1 }
 0x14c   :  { %863 = vst [vmem:[#allocation5 + $0x70] sm:$0xff] %v783_v35  ;;  %903 = vst [vmem:[#allocation5 + $0x1b0] sm:$0xff] %v823_v36  ;;  %v788_v45 = vmul.f32 %v1029_v43, %v1337_v20  ;;  %v828_v46 = vmul.f32 %v1037_v44, %v1385_v32  ;;  %v613_v47 = vpop.f32.mrb[35].mxu0  ;;  %v645_v48 = vpop.f32.mrb[35].mxu1 }
 0x14d   :  { %853 = vst [vmem:[#allocation5 + $0x20] sm:$0xff] %v773_v41  ;;  %893 = vst [vmem:[#allocation5 + $0x160] sm:$0xff] %v813_v42  ;;  %v778_v3 = vmul.f32 %v1325_v0, %v613_v47  ;;  %v818_v31 = vmul.f32 %v1373_v13, %v645_v48 }
 0x14e   :  { %868 = vst [vmem:[#allocation5 + $0x98] sm:$0xff] %v788_v45  ;;  %908 = vst [vmem:[#allocation5 + $0x1d8] sm:$0xff] %v828_v46 }
 0x14f   :  { %858 = vst [vmem:[#allocation5 + $0x48] sm:$0xff] %v778_v3  ;;  %898 = vst [vmem:[#allocation5 + $0x188] sm:$0xff] %v818_v31 }
 0x151   :  { %v1032_v2 = vpop.f32.mrb[36].mxu0  ;;  %v1040_v12 = vpop.f32.mrb[36].mxu1 }
 0x152   :  { %v803_v20 = vmul.f32 %v1032_v2, %v1359_v55  ;;  %v843_v49 = vmul.f32 %v1040_v12, %v762_v11  ;;  %v626_v32 = vpop.f32.mrb[37].mxu0  ;;  %v658_v50 = vpop.f32.mrb[37].mxu1 }
 0x153   :  { %v793_v53 = vmul.f32 %v1347_v37, %v626_v32  ;;  %v833_v54 = vmul.f32 %v1397_v52, %v658_v50  ;;  %v1033_v0 = vpop.f32.mrb[38].mxu0  ;;  %v1041_v57 = vpop.f32.mrb[38].mxu1 }
 0x154   :  { %883 = vst [vmem:[#allocation5 + $0x110] sm:$0xff] %v803_v20  ;;  %923 = vst [vmem:[#allocation5 + $0x250] sm:$0xff] %v843_v49  ;;  %v808_v13 = vmul.f32 %v1033_v0, %v1361_v56  ;;  %v848_v58 = vmul.f32 %v1041_v57, %v1407_v10  ;;  %v629_v59 = vpop.f32.mrb[39].mxu0  ;;  %v661_v60 = vpop.f32.mrb[39].mxu1 }
 0x155   :  { %873 = vst [vmem:[#allocation5 + $0xc0] sm:$0xff] %v793_v53  ;;  %913 = vst [vmem:[#allocation5 + $0x200] sm:$0xff] %v833_v54  ;;  %v798_v55 = vmul.f32 %v1349_v38, %v629_v59  ;;  %v838_v61 = vmul.f32 %v1395_v51, %v661_v60 }
 0x156   :  { %888 = vst [vmem:[#allocation5 + $0x138] sm:$0xff] %v808_v13  ;;  %928 = vst [vmem:[#allocation5 + $0x278] sm:$0xff] %v848_v58 }
 0x157   :  { %878 = vst [vmem:[#allocation5 + $0xe8] sm:$0xff] %v798_v55  ;;  %918 = vst [vmem:[#allocation5 + $0x228] sm:$0xff] %v838_v61 }
 0x158   :  { %1164 = shalt.err (!%p1161_p12)
}
 0x159   :  { %s1165_s21 = scalar_lea.hbm %s1443_s3, 10240 }
 0x15a   :  { %p1166_p13 = scmp.ne.s32.totalorder %s1443_s3, %s1165_s21  ;;  %p1169_p0 = scmp.lt.u32.totalorder %s1165_s21, %s1443_s3 }
 0x15c   :  { %p1171_p1 = pnand %p1169_p0, %p1166_p13 }
 0x15e   :  { %1174 = shalt.err (!%p1171_p1)
}
 0x15f   :  { %s1184_s2 = smov 640   ;;  %s1185_s26 = smov 40  }
 0x160   :  { %940 = dma.vmem_to_hbm [thread:$0]  %s935_s1, 10240, %s1443_s3, [#allocation4], %s1184_s2, %s1184_s2, %s1185_s26  }
 0x161   :  { %1177 = dma.done.wait [#allocation4], 10240  }
 0x162   :  { %1178 = vsyncadd [#allocation4], 4294957056 }
 0x163   :  { %944 = vsyncpa [#allocation3], 1 }
 0x164   :  { %945 = vsyncpa [#allocation4], 1 }

</bundles_post_ra>
